<compile_context>
chip_gen: v7x
topology: tpu7x:2x2x1
jax: 0.10.0
libtpu: 0.0.40
codegen_flags: <defaults>
</compile_context>

<pallas_src>
import functools

import jax
import jax.numpy as jnp
from jax.experimental import pallas as pl
from jax.experimental.pallas import tpu as pltpu

_NEG_INF = -1e30  # large-negative bias masking padded gate lanes


def _round_up(x, m):
    return (x + m - 1) // m * m


def _vmem_capacity_bytes():
    """Physical VMEM capacity (conservative 64 MiB fallback if unqueryable)."""
    try:
        cap = int(pltpu.get_tpu_info().vmem_capacity_bytes)
        if cap > 0:
            return cap
    except Exception:  # pragma: no cover - host / emulation fallback
        pass
    return 64 * 1024 * 1024


# --------------------------------------------------------------------------
# Kernels
# --------------------------------------------------------------------------
def _finalize_from_logits(x_ref, b_ref, o_ref, logits_ref):
    """relu / softmax / highway-combine on the accumulated fused logits."""
    dp = o_ref.shape[-1]
    logits_ref[...] += b_ref[...]

    # Static, lane-tile-aligned ref slices -> zero-cost views of the scratch.
    t = jnp.maximum(logits_ref[:, 0:dp], 0.0)            # transform: relu

    # Gate: numerically-stable softmax over the feature dim.  Padded lanes
    # carry a -1e30 bias so they contribute exp(.) == 0 to the sum.
    g = logits_ref[:, dp:2 * dp]
    g = g - jnp.max(g, axis=-1, keepdims=True)
    e = jnp.exp(g)
    denom = jnp.sum(e, axis=-1, keepdims=True)
    r = pl.reciprocal(denom, approx=True)                 # EUP slot (nearly free)
    r = r * (2.0 - denom * r)                             # one Newton step (~1e-6 rel)
    gate = e * r

    # Highway combine: x + g*(t - x)  (== t*g + (1-g)*x, one fewer VPU op)
    x = x_ref[...].astype(jnp.float32)
    o_ref[...] = (x + gate * (t - x)).astype(o_ref.dtype)


def _highway_kernel_resident(x_ref, w_ref, b_ref, o_ref, logits_ref, *,
                             compute_dtype):
    """Fast path: fused (Dp, 2Dp) weight resident in VMEM, 1-D batch grid."""
    logits_ref[...] = jnp.dot(x_ref[...].astype(compute_dtype), w_ref[...],
                              preferred_element_type=jnp.float32)
    _finalize_from_logits(x_ref, b_ref, o_ref, logits_ref)


def _highway_kernel_ktiled(xk_ref, xfull_ref, w_ref, b_ref, o_ref, logits_ref,
                           *, compute_dtype):
    """Large-D path: K-tiled weight stream, logits accumulated in VMEM scratch."""
    k = pl.program_id(1)

    @pl.when(k == 0)
    def _():
        logits_ref[...] = jnp.zeros_like(logits_ref)

    logits_ref[...] += jnp.dot(xk_ref[...].astype(compute_dtype), w_ref[...],
                               preferred_element_type=jnp.float32)

    @pl.when(k == pl.num_programs(1) - 1)
    def _():
        _finalize_from_logits(xfull_ref, b_ref, o_ref, logits_ref)


# --------------------------------------------------------------------------
# Host-side parameter packing (call ONCE at parameter-load time and reuse)
# --------------------------------------------------------------------------
def prepare_highway_params(w_t, b_t, w_g, b_g, *, weight_dtype=jnp.bfloat16):
    """Pad + fuse the two projections into one (Dp, 2*Dp) weight / (1, 2*Dp) bias.

    Hoisted out of the per-call path: the O(D^2) pad/concat is paid once.
    w_t / w_g are (in, out) layouts (i.e. PyTorch weight.T); b_t / b_g are (D,).
    weight_dtype=bfloat16 halves weight HBM/VMEM traffic and hits the MXU bf16
    rate (accumulation stays f32); pass jnp.float32 for bit-near-f32 numerics.
    """
    D = w_t.shape[0]
    d_pad = _round_up(max(D, 128), 128)
    wt = jnp.zeros((d_pad, d_pad), jnp.float32).at[:D, :D].set(w_t.astype(jnp.float32))
    wg = jnp.zeros((d_pad, d_pad), jnp.float32).at[:D, :D].set(w_g.astype(jnp.float32))
    bt = jnp.zeros((d_pad,), jnp.float32).at[:D].set(b_t.astype(jnp.float32))
    # Padded gate lanes get -1e30 so softmax normalization ignores them exactly.
    bg = jnp.full((d_pad,), _NEG_INF, jnp.float32).at[:D].set(b_g.astype(jnp.float32))

    w_fused = jnp.concatenate([wt, wg], axis=1).astype(weight_dtype)     # (Dp, 2Dp)
    b_fused = jnp.concatenate([bt, bg]).reshape(1, 2 * d_pad)            # (1, 2Dp) f32
    return w_fused, b_fused, D


# --------------------------------------------------------------------------
# Forward wrapper
# --------------------------------------------------------------------------
def highway_layer(x, w_fused, b_fused, input_dim, *, tb=None, tk=None,
                  force_k_tiling=False):
    """HighwayLayer forward.  x: (B, D) float.  Params from prepare_highway_params."""
    B, D = x.shape
    assert D == input_dim
    d_pad = w_fused.shape[0]
    assert w_fused.shape == (d_pad, 2 * d_pad)
    assert b_fused.shape == (1, 2 * d_pad)

    capacity = _vmem_capacity_bytes()
    budget = int(capacity * 0.70)                    # headroom for compiler scratch

    w_itemsize = jnp.dtype(w_fused.dtype).itemsize
    weight_bytes = d_pad * 2 * d_pad * w_itemsize
    bias_bytes = 2 * d_pad * 4

    # --- path selection: resident weight vs K-tiled weight stream ----------
    use_k = force_k_tiling or (weight_bytes > budget // 2)
    if use_k:
        if tk is None:
            # double-buffered weight tile should stay under ~budget/4
            tk = (budget // 4) // (2 * 2 * d_pad * w_itemsize)
        tk = min(d_pad, max(128, (tk // 128) * 128))
        while d_pad % tk != 0:                       # d_pad is a multiple of 128
            tk -= 128
        w_vmem = 2 * tk * 2 * d_pad * w_itemsize     # double-buffered K tiles
    else:
        tk = d_pad
        w_vmem = weight_bytes                        # single-buffered, resident

    # --- batch tile from the VMEM budget ------------------------------------
    b8 = _round_up(B, 8)
    if tb is None:
        # per-row f32 bytes: x (2 bufs) + out (2 bufs) + logits scratch (2Dp)
        # + ~3 transient (Dp) live values in the softmax/combine epilogue
        # + x K-tile bufs on the K-tiled path.
        per_row = (2 * d_pad + 2 * d_pad + 2 * d_pad + 3 * d_pad) * 4
        if use_k:
            per_row += 2 * tk * 4
        tb = max((budget - w_vmem - bias_bytes) // per_row, 8)
        tb = min(tb, 1024, b8)
        # Keep >=2 (prefer >=4) grid steps over batch: megacore sharding on
        # v7x's two TensorCores + DMA/compute pipelining of the x/out streams.
        if b8 >= 256:
            tb = min(tb, b8 // 2)
        if b8 >= 4 * 128:
            tb = min(tb, _round_up(-(-b8 // 4), 128))
        tb = (tb // 128) * 128 if tb >= 128 else (tb // 8) * 8
        tb = max(tb, 8)
        # Shrink tb toward b8/ceil(b8/tb) so b_pad ~= B (avoid padded-row work).
        n_steps = -(-b8 // tb)
        gran = 128 if tb >= 128 else 8
        tb = _round_up(-(-b8 // n_steps), gran)
    tb = max(8, _round_up(min(tb, b8), 8))
    b_pad = _round_up(B, tb)

    # --- input padding (skipped when already aligned) -----------------------
    x_in = x.astype(jnp.float32)
    needs_pad = (b_pad != B) or (d_pad != D)
    if needs_pad:
        x_in = jnp.zeros((b_pad, d_pad), jnp.float32).at[:B, :D].set(x_in)

    compute_dtype = jnp.dtype(w_fused.dtype)
    n_b = b_pad // tb

    if use_k:
        n_k = d_pad // tk
        grid = (n_b, n_k)
        kernel = functools.partial(_highway_kernel_ktiled,
                                   compute_dtype=compute_dtype)
        in_specs = [
            pl.BlockSpec((tb, tk), lambda i, k: (i, k)),            # x K-tile (matmul)
            pl.BlockSpec((tb, d_pad), lambda i, k: (i, 0)),         # full x row (combine)
            pl.BlockSpec((tk, 2 * d_pad), lambda i, k: (k, 0)),     # weight K-tile
            pl.BlockSpec((1, 2 * d_pad), lambda i, k: (0, 0),
                         pipeline_mode=pl.Buffered(1)),             # bias (invariant)
        ]
        out_specs = pl.BlockSpec((tb, d_pad), lambda i, k: (i, 0))
        dim_sem = ("parallel", "arbitrary")
        operands = (x_in, x_in, w_fused, b_fused)
        x_stream_vmem = 2 * tb * tk * 4 + 2 * tb * d_pad * 4
    else:
        grid = (n_b,)
        kernel = functools.partial(_highway_kernel_resident,
                                   compute_dtype=compute_dtype)
        in_specs = [
            pl.BlockSpec((tb, d_pad), lambda i: (i, 0)),            # x tile
            pl.BlockSpec((d_pad, 2 * d_pad), lambda i: (0, 0),
                         pipeline_mode=pl.Buffered(1)),             # resident weight
            pl.BlockSpec((1, 2 * d_pad), lambda i: (0, 0),
                         pipeline_mode=pl.Buffered(1)),             # resident bias
        ]
        out_specs = pl.BlockSpec((tb, d_pad), lambda i: (i, 0))
        dim_sem = ("parallel",)
        operands = (x_in, w_fused, b_fused)
        x_stream_vmem = 2 * tb * d_pad * 4

    # --- VMEM accounting & scoped limit (always set; capped below capacity) --
    vmem_needed = (w_vmem + bias_bytes
                   + x_stream_vmem                 # x tiles (double-buffered)
                   + 2 * tb * d_pad * 4            # out tiles (double-buffered)
                   + tb * 2 * d_pad * 4            # logits scratch
                   + 3 * tb * d_pad * 4)           # live t/e/gate epilogue values
    vmem_limit = int(min(max(vmem_needed * 1.5, 24 * 1024 * 1024),
                         capacity * 0.85))

    cost = pl.CostEstimate(
        flops=2 * b_pad * d_pad * 2 * d_pad + 6 * b_pad * d_pad,
        transcendentals=b_pad * d_pad,
        bytes_accessed=(2 * b_pad * d_pad * 4 + weight_bytes + 2 * d_pad * 4),
    )

    out = pl.pallas_call(
        kernel,
        out_shape=jax.ShapeDtypeStruct((b_pad, d_pad), x.dtype),
        grid_spec=pltpu.PrefetchScalarGridSpec(
            num_scalar_prefetch=0,
            grid=grid,
            in_specs=in_specs,
            out_specs=out_specs,
            scratch_shapes=[pltpu.VMEM((tb, 2 * d_pad), jnp.float32)],
        ),
        compiler_params=pltpu.CompilerParams(
            dimension_semantics=dim_sem,
            vmem_limit_bytes=vmem_limit,
        ),
        cost_estimate=cost,
    )(*operands)

    if needs_pad:
        out = out[:B, :D]
    return out


# --------------------------------------------------------------------------
# Pure-JAX reference
# --------------------------------------------------------------------------
def highway_ref(x, w_t, b_t, w_g, b_g):
    t = jax.nn.relu(x @ w_t + b_t)
    g = jax.nn.softmax(x @ w_g + b_g, axis=-1)
    return t * g + (1.0 - g) * x


if __name__ == "__main__":
    key = jax.random.PRNGKey(0)

    def make_params(k, D):
        kwt, kbt, kwg = jax.random.split(k, 3)
        bound = 1.0 / jnp.sqrt(D)
        w_t = jax.random.uniform(kwt, (D, D), jnp.float32, -bound, bound)  # (in,out)=W.T
        b_t = jax.random.uniform(kbt, (D,), jnp.float32, -bound, bound)
        w_g = jax.random.uniform(kwg, (D, D), jnp.float32, -bound, bound)
        b_g = jnp.full((D,), -2.0, dtype=jnp.float32)                      # gate_bias=-2
        return w_t, b_t, w_g, b_g

    # ---- config 1: module-sized shapes, resident-weight fast path, f32 ----
    B, D = 8, 32
    kx, kp, kx2, kp2 = jax.random.split(key, 4)
    x = jax.random.normal(kx, (B, D), dtype=jnp.float32)
    w_t, b_t, w_g, b_g = make_params(kp, D)
    ref = highway_ref(x, w_t, b_t, w_g, b_g)

    wf32, bfz, _ = prepare_highway_params(w_t, b_t, w_g, b_g,
                                          weight_dtype=jnp.float32)
    out = jax.block_until_ready(highway_layer(x, wf32, bfz, D))
    assert jnp.allclose(out, ref, atol=1e-5, rtol=1e-5), "f32 resident path mismatch"

    # ---- config 2: bf16 weights (default), MXU bf16 rate, f32 accumulation ----
    wb16, bfz2, _ = prepare_highway_params(w_t, b_t, w_g, b_g)  # bf16 default
    out_b = jax.block_until_ready(highway_layer(x, wb16, bfz2, D))
    assert jnp.allclose(out_b, ref, atol=3e-2, rtol=3e-2), "bf16 resident path mismatch"

    # ---- config 3: forced K-tiled reduction path (the large-D / v7x path) ----
    B2, D2 = 24, 256
    x2 = jax.random.normal(kx2, (B2, D2), dtype=jnp.float32)
    w_t2, b_t2, w_g2, b_g2 = make_params(kp2, D2)
    ref2 = highway_ref(x2, w_t2, b_t2, w_g2, b_g2)
    wf32_2, bfz_2, _ = prepare_highway_params(w_t2, b_t2, w_g2, b_g2,
                                              weight_dtype=jnp.float32)
    out_k = jax.block_until_ready(
        highway_layer(x2, wf32_2, bfz_2, D2, force_k_tiling=True, tk=128))
    assert jnp.allclose(out_k, ref2, atol=1e-5, rtol=1e-5), "K-tiled path mismatch"

    print("KERNEL_OK")
</pallas_src>

<mosaic_0001>
module attributes {stable_mosaic.version = 11 : i64} {
  func.func @_highway_kernel_resident(%arg0: i32, %arg1: memref<8x128xf32, #tpu.memory_space<vmem>>, %arg2: memref<128x256xf32, #tpu.memory_space<vmem>>, %arg3: memref<1x256xf32, #tpu.memory_space<vmem>>, %arg4: memref<8x128xf32, #tpu.memory_space<vmem>>, %arg5: memref<8x256xf32, #tpu.memory_space<vmem>>) attributes {dimension_semantics = [#tpu.dimension_semantics<parallel>], iteration_bounds = array<i64: 1>, scalar_prefetch = 0 : i64, scratch_operands = 1 : i64, tpu.core_type = #tpu.core_type<tc>, window_params = [{transform_indices = @transform_0, window_bounds = array<i64: 8, 128>}, {pipeline_mode = #tpu.pipeline_mode<synchronous>, transform_indices = @transform_1, window_bounds = array<i64: 128, 256>}, {pipeline_mode = #tpu.pipeline_mode<synchronous>, transform_indices = @transform_2, window_bounds = array<i64: 1, 256>}, {transform_indices = @transform_3, window_bounds = array<i64: 8, 128>}]} {
    %c0 = arith.constant 0 : index
    %c0_0 = arith.constant 0 : index
    %0 = vector.load %arg1[%c0, %c0_0] : memref<8x128xf32, #tpu.memory_space<vmem>>, vector<8x128xf32>
    %c0_1 = arith.constant 0 : index
    %c0_2 = arith.constant 0 : index
    %1 = vector.load %arg2[%c0_1, %c0_2] : memref<128x256xf32, #tpu.memory_space<vmem>>, vector<128x256xf32>
    %cst = arith.constant dense<0.000000e+00> : vector<8x256xf32>
    %2 = tpu.matmul %0, %1, %cst {dimension_numbers = #tpu.dot_dimension_numbers<[1], [0], [0], [1], [0, 0, 1, 1], [], []>} : vector<8x128xf32>, vector<128x256xf32>, vector<8x256xf32> -> vector<8x256xf32>
    %c0_3 = arith.constant 0 : index
    %c0_4 = arith.constant 0 : index
    %3 = vector.load %arg5[%c0_3, %c0_4] : memref<8x256xf32, #tpu.memory_space<vmem>>, vector<8x256xf32>
    tpu.vector_store %arg5[%c0_3, %c0_4], %2 {strides = array<i32>} : memref<8x256xf32, #tpu.memory_space<vmem>>, vector<8x256xf32>,
    %c0_5 = arith.constant 0 : index
    %c0_6 = arith.constant 0 : index
    %4 = vector.load %arg5[%c0_5, %c0_6] : memref<8x256xf32, #tpu.memory_space<vmem>>, vector<8x256xf32>
    %c0_7 = arith.constant 0 : index
    %c0_8 = arith.constant 0 : index
    %5 = vector.load %arg3[%c0_7, %c0_8] : memref<1x256xf32, #tpu.memory_space<vmem>>, vector<1x256xf32>
    %6 = vector.broadcast %5 : vector<1x256xf32> to vector<8x256xf32>
    %7 = arith.addf %4, %6 : vector<8x256xf32>
    %c0_9 = arith.constant 0 : index
    %c0_10 = arith.constant 0 : index
    %8 = vector.load %arg5[%c0_9, %c0_10] : memref<8x256xf32, #tpu.memory_space<vmem>>, vector<8x256xf32>
    tpu.vector_store %arg5[%c0_9, %c0_10], %7 {strides = array<i32>} : memref<8x256xf32, #tpu.memory_space<vmem>>, vector<8x256xf32>,
    %c0_11 = arith.constant 0 : index
    %c0_12 = arith.constant 0 : index
    %9 = vector.load %arg5[%c0_11, %c0_12] : memref<8x256xf32, #tpu.memory_space<vmem>>, vector<8x128xf32>
    %cst_13 = arith.constant 0.000000e+00 : f32
    %10 = vector.broadcast %cst_13 : f32 to vector<8x128xf32>
    %11 = arith.maximumf %9, %10 : vector<8x128xf32>
    %c0_14 = arith.constant 0 : index
    %c128 = arith.constant 128 : index
    %12 = vector.load %arg5[%c0_14, %c128] : memref<8x256xf32, #tpu.memory_space<vmem>>, vector<8x128xf32>
    %cst_15 = arith.constant dense<0xFF800000> : vector<8xf32>
    %13 = vector.multi_reduction <maximumf>, %12, %cst_15 [1] : vector<8x128xf32> to vector<8xf32>
    %14 = vector.shape_cast %13 : vector<8xf32> to vector<8x1xf32>
    %15 = vector.broadcast %14 : vector<8x1xf32> to vector<8x128xf32>
    %16 = arith.subf %12, %15 : vector<8x128xf32>
    %17 = math.exp %16 : vector<8x128xf32>
    %cst_16 = arith.constant dense<0.000000e+00> : vector<8xf32>
    %18 = vector.multi_reduction <add>, %17, %cst_16 [1] : vector<8x128xf32> to vector<8xf32>
    %19 = vector.shape_cast %18 : vector<8xf32> to vector<8x1xf32>
    %20 = tpu.reciprocal %19 {approx = true} : vector<8x1xf32> -> vector<8x1xf32>
    %21 = arith.mulf %19, %20 : vector<8x1xf32>
    %cst_17 = arith.constant 2.000000e+00 : f32
    %22 = vector.broadcast %cst_17 : f32 to vector<8x1xf32>
    %23 = arith.subf %22, %21 : vector<8x1xf32>
    %24 = arith.mulf %20, %23 : vector<8x1xf32>
    %25 = vector.broadcast %24 : vector<8x1xf32> to vector<8x128xf32>
    %26 = arith.mulf %17, %25 : vector<8x128xf32>
    %c0_18 = arith.constant 0 : index
    %c0_19 = arith.constant 0 : index
    %27 = vector.load %arg1[%c0_18, %c0_19] : memref<8x128xf32, #tpu.memory_space<vmem>>, vector<8x128xf32>
    %28 = arith.subf %11, %27 : vector<8x128xf32>
    %29 = arith.mulf %26, %28 : vector<8x128xf32>
    %30 = arith.addf %27, %29 : vector<8x128xf32>
    %c0_20 = arith.constant 0 : index
    %c0_21 = arith.constant 0 : index
    %31 = vector.load %arg4[%c0_20, %c0_21] : memref<8x128xf32, #tpu.memory_space<vmem>>, vector<8x128xf32>
    tpu.vector_store %arg4[%c0_20, %c0_21], %30 {strides = array<i32>} : memref<8x128xf32, #tpu.memory_space<vmem>>, vector<8x128xf32>,
    return
  }
  func.func @transform_0(%arg0: i32) -> (i32, i32) {
    %c0_i32 = arith.constant 0 : i32
    %c0_i32_0 = arith.constant 0 : i32
    return %arg0, %c0_i32 : i32, i32
  }
  func.func @transform_1(%arg0: i32) -> (i32, i32) {
    %c0_i32 = arith.constant 0 : i32
    %c0_i32_0 = arith.constant 0 : i32
    %c0_i32_1 = arith.constant 0 : i32
    return %c0_i32, %c0_i32_0 : i32, i32
  }
  func.func @transform_2(%arg0: i32) -> (i32, i32) {
    %c0_i32 = arith.constant 0 : i32
    %c0_i32_0 = arith.constant 0 : i32
    %c0_i32_1 = arith.constant 0 : i32
    return %c0_i32, %c0_i32_0 : i32, i32
  }
  func.func @transform_3(%arg0: i32) -> (i32, i32) {
    %c0_i32 = arith.constant 0 : i32
    %c0_i32_0 = arith.constant 0 : i32
    return %arg0, %c0_i32 : i32, i32
  }
}

</mosaic_0001>

<bundles_post_ra>
// kernel: tpu_custom_call.1
= control target key start
LH: loop header
LB: loop body
LE: loop exit
PB: predicated region body
PF: predicated region fallthrough
CT: control target
= control target key end

     0   :  { %8 = vsyncpa [#allocation4], 0  ;;  %s387_s0 = inlined_call_operand.hbm [shape: f32[8,128], index: 0, kind: input, shape index: {}]   ;;  %s388_s1 = inlined_call_operand.hbm [shape: f32[128,256], index: 1, kind: input, shape index: {}]   ;;  %s389_s2 = inlined_call_operand.vmem [shape: f32[1,256], index: 2, kind: input, shape index: {}]   ;;  %s390_s3 = inlined_call_operand.hbm [shape: f32[8,128], index: 3, kind: output, shape index: {}]  }
   0x1   :  { %9 = vsyncpa [#allocation7], 0 }
   0x2   :  { %10 = vsyncpa [#allocation5], 0  ;;  %s315_s12 = smov [#allocation3]   ;;  %s316_s14 = smov [#allocation6]  }
   0x3   :  { %s17_s13 = sshll.u32 %s315_s12, 4  ;;  %s26_s15 = sshll.u32 %s316_s14, 4  ;;  %s18_s13 = int_to_ptr.vmem [resolvable:$true] %s17_s13  ;;  %s341_s15 = int_to_ptr.vmem [resolvable:$true] %s26_s15 }
   0x4   :  { %s243_s18 = scalar_lea.hbm %s387_s0, 128 }
   0x5   :  { %p244_p0 = scmp.ne.s32.totalorder %s387_s0, %s243_s18  ;;  %p247_p1 = scmp.lt.u32.totalorder %s243_s18, %s387_s0 }
   0x7   :  { %p249_p2 = pnand %p247_p1, %p244_p0 }
   0x9   :  { %252 = shalt.err (!%p249_p2)
}
   0xa   :  { %s253_s23 = scalar_lea.vmem %s18_s13, 128  ;;  %p258_p4 = scmp.lt.s32.totalorder %s18_s13, %s18_s13 }
   0xb   :  { %p254_p3 = scmp.ne.s32.totalorder %s18_s13, %s253_s23  ;;  %p259_p5 = scmp.lt.s32.totalorder %s253_s23, %s253_s23 }
   0xd   :  { %p260_p6 = por %p259_p5, %p258_p4 }
   0xf   :  { %p261_p7 = pnand %p260_p6, %p254_p3 }
  0x11   :  { %264 = shalt.err (!%p261_p7)
}
  0x12   :  { %20 = dma.hbm_to_vmem [thread:$0]  %s387_s0, 128, %s18_s13, [#allocation4]  }
  0x13   :  { %s265_s28 = scalar_lea.hbm %s388_s1, 4096 }
  0x14   :  { %p266_p8 = scmp.ne.s32.totalorder %s388_s1, %s265_s28  ;;  %p269_p9 = scmp.lt.u32.totalorder %s265_s28, %s388_s1 }
  0x16   :  { %p271_p10 = pnand %p269_p9, %p266_p8 }
  0x18   :  { %274 = shalt.err (!%p271_p10)
}
  0x19   :  { %s275_s6 = scalar_lea.vmem %s341_s15, 4096  ;;  %p280_p12 = scmp.lt.s32.totalorder %s341_s15, %s341_s15 }
  0x1a   :  { %p276_p11 = scmp.ne.s32.totalorder %s341_s15, %s275_s6  ;;  %p281_p13 = scmp.lt.s32.totalorder %s275_s6, %s275_s6 }
  0x1c   :  { %p282_p0 = por %p281_p13, %p280_p12 }
  0x1e   :  { %p283_p1 = pnand %p282_p0, %p276_p11 }
  0x20   :  { %286 = shalt.err (!%p283_p1)
}
  0x21   :  { %s317_s0 = smov 256   ;;  %s318_s7 = smov 16  }
  0x22   :  { %32 = dma.hbm_to_vmem [thread:$0]  %s388_s1, 4096, %s341_s15, [#allocation7], %s317_s0, %s317_s0, %s318_s7  }
  0x23   :  { %309 = dma.done.wait [#allocation4], 128  }
  0x24   :  { %310 = vsyncadd [#allocation4], 4294967168 }
  0x25   :  { %311 = dma.done.wait [#allocation7], 4096  }
  0x26   :  { %312 = vsyncadd [#allocation7], 4294963200  ;;  %v319_v0 = vmov 0.0   ;;  %v43_v1 = vld [vmem:[#allocation6 + $0x8] sm:$0xff]  ;;  %v45_v2 = vld [vmem:[#allocation6 + $0x18] sm:$0xff]  ;;  %v151_v50 = vlaneseq }
  0x27   :  { %138 = vmatprep.mubr.f32.mxu0 %v319_v0  ;;  %v42_v3 = vld [vmem:[#allocation6] sm:$0xff]  ;;  %v201_v4 = vpack.c.bf16 %v45_v2, %v43_v1  ;;  %v44_v5 = vld [vmem:[#allocation6 + $0x10] sm:$0xff]  ;;  %v47_v6 = vld [vmem:[#allocation6 + $0x28] sm:$0xff] }
  0x28   :  { %v49_v7 = vld [vmem:[#allocation6 + $0x38] sm:$0xff]  ;;  %v203_v8 = vpack.c.bf16 %v44_v5, %v42_v3  ;;  %v46_v10 = vld [vmem:[#allocation6 + $0x20] sm:$0xff]  ;;  %v48_v11 = vld [vmem:[#allocation6 + $0x30] sm:$0xff]  ;;  %v152_v51 = vshrl.u32 %v151_v50, 7 }
  0x29   :  { %v205_v9 = vpack.c.bf16 %v49_v7, %v47_v6  ;;  %v51_v12 = vld [vmem:[#allocation6 + $0x48] sm:$0xff]  ;;  %202 = vmatprep.subr.bf16.mxu0 %v201_v4  ;;  %v53_v13 = vld [vmem:[#allocation6 + $0x58] sm:$0xff]  ;;  %v207_v14 = vpack.c.bf16 %v48_v11, %v46_v10  ;;  %v50_v16 = vld [vmem:[#allocation6 + $0x40] sm:$0xff] }
  0x2a   :  { %204 = vmatpush1.bf16.msra.mxu0 %v203_v8  ;;  %v209_v15 = vpack.c.bf16 %v53_v13, %v51_v12  ;;  %v52_v17 = vld [vmem:[#allocation6 + $0x50] sm:$0xff]  ;;  %v55_v18 = vld [vmem:[#allocation6 + $0x68] sm:$0xff]  ;;  %v57_v19 = vld [vmem:[#allocation6 + $0x78] sm:$0xff]  ;;  %v153_v52 = vsub.s32 0, %v152_v51  ;;  %v157_v55 = vsub.s32 1, %v152_v51 }
  0x2b   :  { %206 = vmatprep.subr.bf16.mxu0 %v205_v9  ;;  %v211_v20 = vpack.c.bf16 %v52_v17, %v50_v16  ;;  %v213_v21 = vpack.c.bf16 %v57_v19, %v55_v18  ;;  %v54_v22 = vld [vmem:[#allocation6 + $0x60] sm:$0xff]  ;;  %v56_v23 = vld [vmem:[#allocation6 + $0x70] sm:$0xff]  ;;  %v59_v24 = vld [vmem:[#allocation6 + $0x88] sm:$0xff] }
  0x2c   :  { %v61_v25 = vld [vmem:[#allocation6 + $0x98] sm:$0xff]  ;;  %v215_v26 = vpack.c.bf16 %v56_v23, %v54_v22  ;;  %v58_v28 = vld [vmem:[#allocation6 + $0x80] sm:$0xff]  ;;  %v60_v29 = vld [vmem:[#allocation6 + $0x90] sm:$0xff] }
  0x2d   :  { %v217_v27 = vpack.c.bf16 %v61_v25, %v59_v24  ;;  %v63_v30 = vld [vmem:[#allocation6 + $0xa8] sm:$0xff]  ;;  %v65_v31 = vld [vmem:[#allocation6 + $0xb8] sm:$0xff]  ;;  %v219_v32 = vpack.c.bf16 %v60_v29, %v58_v28  ;;  %v62_v34 = vld [vmem:[#allocation6 + $0xa0] sm:$0xff] }
  0x2e   :  { %208 = vmatpush1.bf16.msra.mxu0 %v207_v14  ;;  %v221_v33 = vpack.c.bf16 %v65_v31, %v63_v30  ;;  %v64_v35 = vld [vmem:[#allocation6 + $0xb0] sm:$0xff]  ;;  %v67_v36 = vld [vmem:[#allocation6 + $0xc8] sm:$0xff]  ;;  %v69_v37 = vld [vmem:[#allocation6 + $0xd8] sm:$0xff] }
  0x2f   :  { %210 = vmatprep.subr.bf16.mxu0 %v209_v15  ;;  %v223_v38 = vpack.c.bf16 %v64_v35, %v62_v34  ;;  %v225_v39 = vpack.c.bf16 %v69_v37, %v67_v36  ;;  %v66_v40 = vld [vmem:[#allocation6 + $0xc0] sm:$0xff]  ;;  %v68_v41 = vld [vmem:[#allocation6 + $0xd0] sm:$0xff]  ;;  %v71_v42 = vld [vmem:[#allocation6 + $0xe8] sm:$0xff] }
  0x30   :  { %v73_v43 = vld [vmem:[#allocation6 + $0xf8] sm:$0xff]  ;;  %v227_v44 = vpack.c.bf16 %v68_v41, %v66_v40  ;;  %v70_v46 = vld [vmem:[#allocation6 + $0xe0] sm:$0xff]  ;;  %v72_v47 = vld [vmem:[#allocation6 + $0xf0] sm:$0xff] }
  0x31   :  { %v229_v45 = vpack.c.bf16 %v73_v43, %v71_v42  ;;  %v231_v48 = vpack.c.bf16 %v72_v47, %v70_v46  ;;  %v41_v49 = vld [vmem:[#allocation3] sm:$0xff] }
  0x32   :  { %212 = vmatpush1.bf16.msra.mxu0 %v211_v20  ;;  %v149_v53 = vld [vmem:[%s389_s2] sm:$0x3]  ;;  %s320_s2 = smov [#allocation8]  }
  0x33   :  { %214 = vmatprep.subr.bf16.mxu0 %v213_v21  ;;  %v154_v54 = vrot.slane %v149_v53, %v153_v52  ;;  %v158_v56 = vrot.slane %v149_v53, %v157_v55  ;;  %s191_s11 = sshll.u32 %s320_s2, 4  ;;  %s192_s11 = int_to_ptr.vmem [resolvable:$true] %s191_s11 }
  0x34   :  { %s287_s12 = scalar_lea.vmem %s192_s11, 128  ;;  %p292_p3 = scmp.lt.s32.totalorder %s192_s11, %s192_s11 }
  0x35   :  { %p288_p2 = scmp.ne.s32.totalorder %s192_s11, %s287_s12  ;;  %p293_p4 = scmp.lt.s32.totalorder %s287_s12, %s287_s12 }
  0x36   :  { %216 = vmatpush1.bf16.msra.mxu0 %v215_v26 }
  0x37   :  { %218 = vmatprep.subr.bf16.mxu0 %v217_v27  ;;  %p294_p5 = por %p293_p4, %p292_p3 }
  0x39   :  { %p295_p6 = pnand %p294_p5, %p288_p2 }
  0x3a   :  { %220 = vmatpush1.bf16.msra.mxu0 %v219_v32 }
  0x3b   :  { %222 = vmatprep.subr.bf16.mxu0 %v221_v33 }
  0x3e   :  { %224 = vmatpush1.bf16.msra.mxu0 %v223_v38 }
  0x3f   :  { %226 = vmatprep.subr.bf16.mxu0 %v225_v39 }
  0x42   :  { %228 = vmatpush1.bf16.msra.mxu0 %v227_v44 }
  0x43   :  { %230 = vmatprep.subr.bf16.mxu0 %v229_v45 }
  0x46   :  { %232 = vmatpush1.bf16.msra.mxu0 %v231_v48 }
  0x49   :  { %139 = vmatmul.mubr.f32.vlgmr.msra.gmra.mrb[0].mxu0 %v41_v49 }
 0x11c   :  { %v140_v57 = vpop.f32.mrb[0].mxu0 }
 0x11d   :  { %v161_v58 = vadd.f32 %v154_v54, %v140_v57  ;;  %v142_v59 = vpop.f32.mrb[1].mxu0 }
 0x11e   :  { %v162_v60 = vadd.f32 %v158_v56, %v142_v59 }
 0x11f   :  { %v166_v4 = vmax.f32 %v161_v58, 0.0 }
 0x120   :  { %168 = vmax.xlane.f32.xlu0 %v162_v60 }
 0x121   :  { %v181_v7 = vsub.f32 %v166_v4, %v41_v49 }
 0x1ad   :  { %v169_v61 = vpop.xlane.xlu0 %168 }
 0x1ae   :  { %v170_v62 = vsub.f32 %v162_v60, %v169_v61 }
 0x1b0   :  { %v171_v63 = vmul.f32 1.442695, %v170_v62 }
 0x1b2   :  { %239 = vpow2.f32 %v171_v63 }
 0x1bc   :  { %v240_v0 = vpop.eup %239 }
 0x1bd   :  { %173 = vadd.xlane.f32.xlu0 %v240_v0 }
 0x24a   :  { %v174_v1 = vpop.xlane.xlu0 %173 }
 0x24b   :  { %241 = vrcp.f32 %v174_v1 }
 0x255   :  { %v242_v2 = vpop.eup %241 }
 0x256   :  { %v176_v3 = vmul.f32 %v242_v2, %v174_v1 }
 0x258   :  { %v177_v5 = vsub.f32 2.0, %v176_v3 }
 0x25a   :  { %v178_v6 = vmul.f32 %v242_v2, %v177_v5 }
 0x25c   :  { %v179_v8 = vmul.f32 %v240_v0, %v178_v6 }
 0x25e   :  { %v182_v9 = vmul.f32 %v181_v7, %v179_v8 }
 0x260   :  { %v183_v10 = vadd.f32 %v182_v9, %v41_v49 }
 0x262   :  { %184 = vst [vmem:[#allocation8] sm:$0xff] %v183_v10 }
 0x263   :  { %298 = shalt.err (!%p295_p6)
}
 0x264   :  { %s299_s15 = scalar_lea.hbm %s390_s3, 128 }
 0x265   :  { %p300_p7 = scmp.ne.s32.totalorder %s390_s3, %s299_s15  ;;  %p303_p8 = scmp.lt.u32.totalorder %s299_s15, %s390_s3 }
 0x267   :  { %p305_p9 = pnand %p303_p8, %p300_p7 }
 0x269   :  { %308 = shalt.err (!%p305_p9)
}
 0x26a   :  { %194 = dma.vmem_to_hbm [thread:$0]  %s192_s11, 128, %s390_s3, [#allocation5]  }
 0x26b   :  { %313 = dma.done.wait [#allocation5], 128  }
 0x26c   :  { %314 = vsyncadd [#allocation5], 4294967168 }
 0x26d   :  { %198 = vsyncpa [#allocation4], 1 }
 0x26e   :  { %199 = vsyncpa [#allocation7], 1 }
 0x26f   :  { %200 = vsyncpa [#allocation5], 1 }

</bundles_post_ra>
